<compile_context>
chip_gen: v7x
topology: tpu7x:2x2x1
jax: 0.10.0
libtpu: 0.0.40
codegen_flags: <defaults>
</compile_context>

<pallas_src>
import jax
import jax.numpy as jnp
from jax.experimental import pallas as pl
from jax.experimental.pallas import tpu as pltpu


def _identity_copy_kernel(x_ref, o_ref):
    # Single whole-block, lane-dense copy: one wide store per grid step.
    o_ref[...] = x_ref[...]


def _choose_row_tile(rows, cols, dtype, budget_bytes=2 << 20):
    """Largest row tile that (a) divides `rows`, (b) is a multiple of the
    sublane packing for `dtype`, and (c) keeps the block <= ~2 MiB so that
    2 input + 2 output double-buffers (4x block) fit comfortably under the
    default scoped-VMEM limit on v5e (16 MiB) as well as v6e/v7x (32 MiB).
    Falls back to the full extent (always a legal block) for tiny arrays."""
    itemsize = jnp.dtype(dtype).itemsize
    pack = 8 * max(1, 4 // itemsize)  # 8 rows f32, 16 rows bf16, 32 rows int8
    if rows <= pack:
        return rows
    candidates = [t for t in range(pack, rows + 1, pack) if rows % t == 0]
    if not candidates:
        return rows
    fitting = [t for t in candidates if t * cols * itemsize <= budget_bytes]
    return max(fitting) if fitting else min(candidates)


def pallas_flatten(x):
    """NCHW -> (N, C*H*W) flatten (torch .view(N, -1) on contiguous data).

    The flatten itself is a free metadata reshape; the Pallas call is a
    lane-dense, in-place (aliased) identity copy kept as the Lambda demo.
    """
    N = x.shape[0]
    feat = 1
    for d in x.shape[1:]:
        feat *= d

    # Present the data as a lane-dense 2D slab: (N*C, H*W) for NCHW inputs
    # (8 x 256 for the demo shape), otherwise (N, feat).
    if x.ndim == 4:
        rows, cols = N * x.shape[1], x.shape[2] * x.shape[3]
    else:
        rows, cols = N, feat

    # Free reshape on contiguous data (no data movement).
    flat = jnp.reshape(x, (rows, cols))

    row_tile = _choose_row_tile(rows, cols, x.dtype)
    grid = (pl.cdiv(rows, row_tile),)  # row_tile divides rows by construction

    itemsize = jnp.dtype(x.dtype).itemsize
    out2d = pl.pallas_call(
        _identity_copy_kernel,
        grid=grid,
        in_specs=[pl.BlockSpec((row_tile, cols), lambda i: (i, 0))],
        out_specs=pl.BlockSpec((row_tile, cols), lambda i: (i, 0)),
        out_shape=jax.ShapeDtypeStruct((rows, cols), x.dtype),
        # In-place: output aliases the reshaped input buffer, so the demo copy
        # adds zero new HBM allocation to peak footprint.
        input_output_aliases={0: 0},
        compiler_params=pltpu.CompilerParams(
            # Disjoint output blocks per step -> safe to shard steps across
            # TensorCores (helps v7x when grid > 1; no-op on v5e/v6e).
            dimension_semantics=("parallel",)),
        cost_estimate=pl.CostEstimate(
            flops=0,
            transcendentals=0,
            bytes_accessed=2 * rows * cols * itemsize),
    )(flat)

    # Free reshape back to the torch .view(N, -1) shape.
    return jnp.reshape(out2d, (N, feat))


class Lambda:
    """JAX analogue of the PyTorch Lambda module: forward(x) = func(x)."""

    def __init__(self, func):
        self.func = func

    def __call__(self, x):
        return self.func(x)


if __name__ == "__main__":
    key = jax.random.PRNGKey(0)
    # Small NCHW input consistent with how Lambda(flatten) is used after convs.
    N, C, H, W = 2, 4, 16, 16
    x = jax.random.normal(key, (N, C, H, W), dtype=jnp.float32)

    model = Lambda(pallas_flatten)  # Lambda(lambda x: x.view(x.size(0), -1))

    out = model(x)
    out = jax.block_until_ready(out)

    # Reference semantics: torch .view(N, -1) on a contiguous NCHW tensor is a
    # row-major flatten over (C, H, W) == jnp.reshape on the NCHW array.
    ref = jnp.reshape(x, (N, C * H * W))
    assert out.shape == (N, C * H * W), out.shape
    assert out.dtype == x.dtype, out.dtype
    assert bool(jnp.array_equal(out, ref)), "mismatch vs reference flatten"

    print("KERNEL_OK")
</pallas_src>

<mosaic_0001>
module attributes {stable_mosaic.version = 11 : i64} {
  func.func @_identity_copy_kernel(%arg0: i32, %arg1: memref<8x256xf32, #tpu.memory_space<vmem>>, %arg2: memref<8x256xf32, #tpu.memory_space<vmem>>) attributes {dimension_semantics = [#tpu.dimension_semantics<parallel>], iteration_bounds = array<i64: 1>, scalar_prefetch = 0 : i64, scratch_operands = 0 : i64, tpu.core_type = #tpu.core_type<tc>, window_params = [{transform_indices = @transform_0, window_bounds = array<i64: 8, 256>}, {transform_indices = @transform_1, window_bounds = array<i64: 8, 256>}]} {
    %c0 = arith.constant 0 : index
    %c0_0 = arith.constant 0 : index
    %0 = vector.load %arg1[%c0, %c0_0] : memref<8x256xf32, #tpu.memory_space<vmem>>, vector<8x256xf32>
    %c0_1 = arith.constant 0 : index
    %c0_2 = arith.constant 0 : index
    %1 = vector.load %arg2[%c0_1, %c0_2] : memref<8x256xf32, #tpu.memory_space<vmem>>, vector<8x256xf32>
    tpu.vector_store %arg2[%c0_1, %c0_2], %0 {strides = array<i32>} : memref<8x256xf32, #tpu.memory_space<vmem>>, vector<8x256xf32>,
    return
  }
  func.func @transform_0(%arg0: i32) -> (i32, i32) {
    %c0_i32 = arith.constant 0 : i32
    %c0_i32_0 = arith.constant 0 : i32
    return %arg0, %c0_i32 : i32, i32
  }
  func.func @transform_1(%arg0: i32) -> (i32, i32) {
    %c0_i32 = arith.constant 0 : i32
    %c0_i32_0 = arith.constant 0 : i32
    return %arg0, %c0_i32 : i32, i32
  }
}

</mosaic_0001>

<bundles_post_ra>
// kernel: tpu_custom_call.1
= control target key start
LH: loop header
LB: loop body
LE: loop exit
PB: predicated region body
PF: predicated region fallthrough
CT: control target
= control target key end

     0   :  { %6 = vsyncpa [#allocation3], 0  ;;  %s126_s0 = inlined_call_operand.hbm [shape: f32[8,256], index: 0, kind: input, shape index: {}, may-alias: {0,1}]   ;;  %s127_s1 = inlined_call_operand.hbm [shape: f32[8,256], index: 1, kind: output, shape index: {}, may-alias: {0,1}]  }
   0x1   :  { %7 = vsyncpa [#allocation4], 0  ;;  %s90_s6 = smov [#allocation2]   ;;  %s42_s10 = scalar_lea.hbm %s126_s0, 256 }
   0x2   :  { %s14_s7 = sshll.u32 %s90_s6, 4  ;;  %p43_p0 = scmp.ne.s32.totalorder %s126_s0, %s42_s10  ;;  %s15_s7 = int_to_ptr.vmem [resolvable:$true] %s14_s7 }
   0x3   :  { %p46_p1 = scmp.lt.u32.totalorder %s42_s10, %s126_s0 }
   0x5   :  { %p48_p2 = pnand %p46_p1, %p43_p0 }
   0x7   :  { %51 = shalt.err (!%p48_p2)
}
   0x8   :  { %s52_s15 = scalar_lea.vmem %s15_s7, 256  ;;  %p57_p4 = scmp.lt.s32.totalorder %s15_s7, %s15_s7 }
   0x9   :  { %p53_p3 = scmp.ne.s32.totalorder %s15_s7, %s52_s15  ;;  %p58_p5 = scmp.lt.s32.totalorder %s52_s15, %s52_s15 }
   0xb   :  { %p59_p6 = por %p58_p5, %p57_p4 }
   0xd   :  { %p60_p7 = pnand %p59_p6, %p53_p3 }
   0xf   :  { %63 = shalt.err (!%p60_p7)
}
  0x10   :  { %17 = dma.hbm_to_vmem [thread:$0]  %s126_s0, 256, %s15_s7, [#allocation3]  }
  0x11   :  { %86 = dma.done.wait [#allocation3], 256  }
  0x12   :  { %87 = vsyncadd [#allocation3], 4294967040  ;;  %s91_s18 = smov [#allocation5]   ;;  %v21_v0 = vld [vmem:[#allocation2] sm:$0xff]  ;;  %v22_v1 = vld [vmem:[#allocation2 + $0x8] sm:$0xff] }
  0x13   :  { %s31_s19 = sshll.u32 %s91_s18, 4  ;;  %23 = vst [vmem:[#allocation5] sm:$0xff] %v21_v0  ;;  %24 = vst [vmem:[#allocation5 + $0x8] sm:$0xff] %v22_v1  ;;  %s32_s19 = int_to_ptr.vmem [resolvable:$true] %s31_s19 }
  0x14   :  { %s64_s20 = scalar_lea.vmem %s32_s19, 256  ;;  %p69_p9 = scmp.lt.s32.totalorder %s32_s19, %s32_s19 }
  0x15   :  { %p65_p8 = scmp.ne.s32.totalorder %s32_s19, %s64_s20  ;;  %p70_p10 = scmp.lt.s32.totalorder %s64_s20, %s64_s20 }
  0x17   :  { %p71_p11 = por %p70_p10, %p69_p9 }
  0x19   :  { %p72_p12 = pnand %p71_p11, %p65_p8 }
  0x1b   :  { %75 = shalt.err (!%p72_p12)
}
  0x1c   :  { %s76_s0 = scalar_lea.hbm %s127_s1, 256 }
  0x1d   :  { %p77_p13 = scmp.ne.s32.totalorder %s127_s1, %s76_s0  ;;  %p80_p0 = scmp.lt.u32.totalorder %s76_s0, %s127_s1 }
  0x1f   :  { %p82_p1 = pnand %p80_p0, %p77_p13 }
  0x21   :  { %85 = shalt.err (!%p82_p1)
}
  0x22   :  { %34 = dma.vmem_to_hbm [thread:$0]  %s32_s19, 256, %s127_s1, [#allocation4]  }
  0x23   :  { %88 = dma.done.wait [#allocation4], 256  }
  0x24   :  { %89 = vsyncadd [#allocation4], 4294967040 }
  0x25   :  { %38 = vsyncpa [#allocation3], 1 }
  0x26   :  { %39 = vsyncpa [#allocation4], 1 }

</bundles_post_ra>
